<compile_context>
chip_gen: v7x
topology: tpu7x:2x2x1
jax: 0.10.0
libtpu: 0.0.40
codegen_flags: <defaults>
</compile_context>

<pallas_src>
import jax
import jax.numpy as jnp
from jax.experimental import pallas as pl
from jax.experimental.pallas import tpu as pltpu


def _mha_kernel(q_ref, k_ref, v_ref,
                wq_ref, bq_ref, wk_ref, bk_ref,
                bn_scale_ref, bn_shift_ref,
                w2_ref, b2_ref, sel_ref,
                out_ref, attn_ref):
    """One batch tile: fc1_q -> temporal mean -> BN(eval) -> fc2 -> fc1_k -> attention."""
    f32 = jnp.float32
    tb, seq_len, d_in = q_ref.shape
    hdk = wq_ref.shape[1]
    n_head = sel_ref.shape[1]
    mm = wq_ref.dtype                      # MXU operand dtype (f32 or bf16)

    # --- query path: mean over seq commutes with the affine fc1_q (saves an L-x bigger matmul)
    q_mean = jnp.mean(q_ref[...].astype(f32), axis=1)                    # (tb, d_in)
    qp = jnp.dot(q_mean.astype(mm), wq_ref[...],
                 preferred_element_type=f32) + bq_ref[...]                # (tb, hdk)
    qn = qp * bn_scale_ref[...] + bn_shift_ref[...]                       # BatchNorm1d (eval)
    qf = jnp.dot(qn.astype(mm), w2_ref[...],
                 preferred_element_type=f32) + b2_ref[...]                # (tb, hdk)

    # --- key path: fc1_k on every (batch, seq) row
    k2 = k_ref[...].reshape(tb * seq_len, d_in)
    kp = jnp.dot(k2, wk_ref[...], preferred_element_type=f32) + bk_ref[...]   # (tb*L, hdk)
    kp3 = kp.reshape(tb, seq_len, hdk)

    # --- all heads' scores in one MXU pass:
    # scores[t,l,h] = (1/temp) * sum_{c in head h} kp3[t,l,c] * qf[t,c]
    prod = kp3 * qf[:, None, :]                                           # (tb, L, hdk) f32
    scores = jnp.dot(prod.reshape(tb * seq_len, hdk), sel_ref[...],
                     preferred_element_type=f32).reshape(tb, seq_len, n_head)

    # softmax over the sequence axis (numerically stabilised), per (batch, head)
    m = jnp.max(scores, axis=1, keepdims=True)
    e = jnp.exp(scores - m)
    denom = jnp.sum(e, axis=1, keepdims=True)
    a = e * pl.reciprocal(denom, approx=False)                            # (tb, L, H)

    # head-major attention weights; single lane-dense store
    at = jnp.swapaxes(a, 1, 2)                                            # (tb, H, L)
    attn_ref[...] = at.reshape(tb, n_head * seq_len).astype(attn_ref.dtype)

    # per-head outputs: out[t,h,:] = sum_l a[t,l,h] * v[t,l,:]  (batched MXU matmul)
    out3 = jnp.einsum('bhl,bld->bhd', at.astype(v_ref.dtype), v_ref[...],
                      preferred_element_type=f32)                         # (tb, H, d_in)
    out_ref[...] = out3.reshape(tb, n_head * d_in).astype(out_ref.dtype)


def multi_head_attention(q, k, v, params, *, n_head, d_k, bn_eps=1e-5,
                         compute_dtype=jnp.float32, block_b=64):
    """Pallas TPU implementation of MultiHeadAttention.forward (eval mode).

    q, k, v: (sz_b, seq_len, d_in) float arrays.
    params : dict with 'wq','bq','wk','bk' (fc1_q/fc1_k), 'w2','b2' (fc2 linear),
             'bn_gamma','bn_beta','bn_mean','bn_var' (BatchNorm1d running stats).
    Returns (output, attn) with PyTorch shapes (n_head, sz_b, d_in) and (n_head*sz_b, 1, seq_len).
    """
    f32 = jnp.float32
    sz_b, seq_len, d_in = q.shape
    hdk = n_head * d_k
    temperature = float(d_k) ** 0.5

    # Batch tiling (linear in batch). Tile rows of the 2-D outputs must be a multiple of 8
    # unless the tile spans the whole (padded) batch.
    if sz_b <= block_b:
        tb, b_pad = sz_b, sz_b
    else:
        tb = max(8, (block_b // 8) * 8)
        b_pad = int(pl.cdiv(sz_b, tb)) * tb

    def prep_x(x):
        x = jnp.asarray(x, dtype=compute_dtype)
        if b_pad != sz_b:
            x = jnp.pad(x, ((0, b_pad - sz_b), (0, 0), (0, 0)))
        return x

    q3, k3, v3 = prep_x(q), prep_x(k), prep_x(v)

    def vec(a):
        return jnp.asarray(a, dtype=f32).reshape(1, hdk)

    wq_t = jnp.asarray(params['wq'], f32).T.astype(compute_dtype)         # (d_in, hdk)
    wk_t = jnp.asarray(params['wk'], f32).T.astype(compute_dtype)         # (d_in, hdk)
    w2_t = jnp.asarray(params['w2'], f32).T.astype(compute_dtype)         # (hdk, hdk)
    bq, bk, b2 = vec(params['bq']), vec(params['bk']), vec(params['b2'])

    # BatchNorm1d (eval) folded into one scale/shift pair (pure parameter preprocessing).
    rvar = vec(params['bn_var'])
    bn_scale = vec(params['bn_gamma']) / jnp.sqrt(rvar + f32(bn_eps))
    bn_shift = vec(params['bn_beta']) - vec(params['bn_mean']) * bn_scale

    # Block-diagonal per-head selection matrix with 1/temperature folded in: sel[c,h] = [c//d_k==h]/temp
    head_of = jnp.arange(hdk, dtype=jnp.int32) // d_k
    sel = (head_of[:, None] == jnp.arange(n_head, dtype=jnp.int32)[None, :]).astype(f32)
    sel = sel * jnp.float32(1.0 / temperature)                            # (hdk, n_head)

    grid = (b_pad // tb,)
    tile3 = pl.BlockSpec((tb, seq_len, d_in), lambda b: (b, 0, 0))

    def const(shape):
        return pl.BlockSpec(shape, lambda b: (0, 0))

    in_specs = [tile3, tile3, tile3,
                const((d_in, hdk)), const((1, hdk)),
                const((d_in, hdk)), const((1, hdk)),
                const((1, hdk)), const((1, hdk)),
                const((hdk, hdk)), const((1, hdk)),
                const((hdk, n_head))]
    out_specs = (pl.BlockSpec((tb, n_head * d_in), lambda b: (b, 0)),
                 pl.BlockSpec((tb, seq_len * n_head), lambda b: (b, 0)))
    out_shape = (jax.ShapeDtypeStruct((b_pad, n_head * d_in), f32),
                 jax.ShapeDtypeStruct((b_pad, seq_len * n_head), f32))

    # Explicit VMEM budget: double-buffered per-step tiles + resident weights + slack.
    isz = jnp.dtype(compute_dtype).itemsize
    tile_bytes = 3 * tb * seq_len * d_in * isz + tb * (n_head * d_in + seq_len * n_head) * 4
    weight_bytes = (2 * d_in * hdk + hdk * hdk) * isz + (6 * hdk + hdk * n_head) * 4
    vmem_limit = int(min(64 << 20, max(4 << 20, 4 * tile_bytes + 2 * weight_bytes + (2 << 20))))

    out2d, attn2d = pl.pallas_call(
        _mha_kernel,
        out_shape=out_shape,
        grid=grid,
        in_specs=in_specs,
        out_specs=out_specs,
        compiler_params=pltpu.CompilerParams(
            dimension_semantics=("parallel",),
            vmem_limit_bytes=vmem_limit),
    )(q3, k3, v3, wq_t, bq, wk_t, bk, bn_scale, bn_shift, w2_t, b2, sel)

    out2d = out2d[:sz_b]
    attn2d = attn2d[:sz_b]
    output = out2d.reshape(sz_b, n_head, d_in).transpose(1, 0, 2)          # (H, B, d_in)
    attn = attn2d.reshape(sz_b, n_head, seq_len).transpose(1, 0, 2)        # (H, B, L)
    attn = attn.reshape(n_head * sz_b, 1, seq_len)
    return output, attn


def _mha_ref(q, k, v, p, *, n_head, d_k, bn_eps=1e-5):
    """Pure-JAX reference mirroring the PyTorch module (eval mode)."""
    sz_b, seq_len, d_in = q.shape
    hdk = n_head * d_k
    temperature = float(d_k) ** 0.5

    qp = q @ p['wq'].T + p['bq']                                    # (B, L, hdk)
    qm = qp.reshape(sz_b, seq_len, n_head, d_k).mean(axis=1)        # (B, H, Dk)
    qm = qm.reshape(sz_b, hdk)
    qn = (qm - p['bn_mean']) / jnp.sqrt(p['bn_var'] + bn_eps) * p['bn_gamma'] + p['bn_beta']
    qf = qn @ p['w2'].T + p['b2']                                   # (B, hdk)
    qh = qf.reshape(sz_b, n_head, d_k).transpose(1, 0, 2).reshape(n_head * sz_b, d_k)

    kp = (k @ p['wk'].T + p['bk']).reshape(sz_b, seq_len, n_head, d_k)
    kh = kp.transpose(2, 0, 1, 3).reshape(n_head * sz_b, seq_len, d_k)
    vh = jnp.tile(v, (n_head, 1, 1))                                # (H*B, L, d_in)

    attn = jnp.einsum('nd,nld->nl', qh, kh) / temperature
    attn = jax.nn.softmax(attn, axis=-1)
    out = jnp.einsum('nl,nld->nd', attn, vh)
    return out.reshape(n_head, sz_b, d_in), attn.reshape(n_head * sz_b, 1, seq_len)


if __name__ == "__main__":
    key = jax.random.PRNGKey(0)
    ks = jax.random.split(key, 13)

    n_head, d_k, d_in = 4, 8, 32
    sz_b, seq_len = 2, 8
    hdk = n_head * d_k

    q = jax.random.normal(ks[0], (sz_b, seq_len, d_in), dtype=jnp.float32)
    k = jax.random.normal(ks[1], (sz_b, seq_len, d_in), dtype=jnp.float32)
    v = jax.random.normal(ks[2], (sz_b, seq_len, d_in), dtype=jnp.float32)

    params = {
        'wq': jax.random.normal(ks[3], (hdk, d_in)) * (2.0 / d_k) ** 0.5,
        'bq': 0.1 * jax.random.normal(ks[4], (hdk,)),
        'wk': jax.random.normal(ks[5], (hdk, d_in)) * (2.0 / d_k) ** 0.5,
        'bk': 0.1 * jax.random.normal(ks[6], (hdk,)),
        'w2': 0.1 * jax.random.normal(ks[7], (hdk, hdk)),
        'b2': 0.1 * jax.random.normal(ks[8], (hdk,)),
        'bn_gamma': 1.0 + 0.1 * jax.random.normal(ks[9], (hdk,)),
        'bn_beta': 0.1 * jax.random.normal(ks[10], (hdk,)),
        'bn_mean': 0.1 * jax.random.normal(ks[11], (hdk,)),
        'bn_var': 1.0 + 0.1 * jnp.abs(jax.random.normal(ks[12], (hdk,))),
    }
    params = {name: val.astype(jnp.float32) for name, val in params.items()}

    # f32 path (exact)
    out, attn = multi_head_attention(q, k, v, params, n_head=n_head, d_k=d_k)
    out, attn = jax.block_until_ready((out, attn))

    out_ref, attn_ref = _mha_ref(q, k, v, params, n_head=n_head, d_k=d_k)

    assert out.shape == (n_head, sz_b, d_in)
    assert attn.shape == (n_head * sz_b, 1, seq_len)
    assert jnp.allclose(out, out_ref, atol=1e-4, rtol=1e-4), (out, out_ref)
    assert jnp.allclose(attn, attn_ref, atol=2e-5, rtol=1e-4), (attn, attn_ref)

    # bf16 MXU-operand path (v6e/v7x recommendation): f32 accumulation, loose tolerance.
    out_bf, attn_bf = multi_head_attention(q, k, v, params, n_head=n_head, d_k=d_k,
                                           compute_dtype=jnp.bfloat16)
    out_bf, attn_bf = jax.block_until_ready((out_bf, attn_bf))
    assert jnp.allclose(out_bf, out_ref, atol=0.2, rtol=0.1)
    assert jnp.allclose(attn_bf, attn_ref, atol=0.1, rtol=0.1)

    print("KERNEL_OK")
</pallas_src>

<mosaic_0001>
module attributes {stable_mosaic.version = 11 : i64} {
  func.func @_mha_kernel(%arg0: i32, %arg1: memref<2x8x32xf32, #tpu.memory_space<vmem>>, %arg2: memref<2x8x32xf32, #tpu.memory_space<vmem>>, %arg3: memref<2x8x32xf32, #tpu.memory_space<vmem>>, %arg4: memref<32x32xf32, #tpu.memory_space<vmem>>, %arg5: memref<1x32xf32, #tpu.memory_space<vmem>>, %arg6: memref<32x32xf32, #tpu.memory_space<vmem>>, %arg7: memref<1x32xf32, #tpu.memory_space<vmem>>, %arg8: memref<1x32xf32, #tpu.memory_space<vmem>>, %arg9: memref<1x32xf32, #tpu.memory_space<vmem>>, %arg10: memref<32x32xf32, #tpu.memory_space<vmem>>, %arg11: memref<1x32xf32, #tpu.memory_space<vmem>>, %arg12: memref<32x4xf32, #tpu.memory_space<vmem>>, %arg13: memref<2x128xf32, #tpu.memory_space<vmem>>, %arg14: memref<2x32xf32, #tpu.memory_space<vmem>>) attributes {dimension_semantics = [#tpu.dimension_semantics<parallel>], iteration_bounds = array<i64: 1>, scalar_prefetch = 0 : i64, scratch_operands = 0 : i64, tpu.core_type = #tpu.core_type<tc>, window_params = [{transform_indices = @transform_0, window_bounds = array<i64: 2, 8, 32>}, {transform_indices = @transform_1, window_bounds = array<i64: 2, 8, 32>}, {transform_indices = @transform_2, window_bounds = array<i64: 2, 8, 32>}, {pipeline_mode = #tpu.pipeline_mode<synchronous>, transform_indices = @transform_3, window_bounds = array<i64: 32, 32>}, {pipeline_mode = #tpu.pipeline_mode<synchronous>, transform_indices = @transform_4, window_bounds = array<i64: 1, 32>}, {pipeline_mode = #tpu.pipeline_mode<synchronous>, transform_indices = @transform_5, window_bounds = array<i64: 32, 32>}, {pipeline_mode = #tpu.pipeline_mode<synchronous>, transform_indices = @transform_6, window_bounds = array<i64: 1, 32>}, {pipeline_mode = #tpu.pipeline_mode<synchronous>, transform_indices = @transform_7, window_bounds = array<i64: 1, 32>}, {pipeline_mode = #tpu.pipeline_mode<synchronous>, transform_indices = @transform_8, window_bounds = array<i64: 1, 32>}, {pipeline_mode = #tpu.pipeline_mode<synchronous>, transform_indices = @transform_9, window_bounds = array<i64: 32, 32>}, {pipeline_mode = #tpu.pipeline_mode<synchronous>, transform_indices = @transform_10, window_bounds = array<i64: 1, 32>}, {pipeline_mode = #tpu.pipeline_mode<synchronous>, transform_indices = @transform_11, window_bounds = array<i64: 32, 4>}, {transform_indices = @transform_12, window_bounds = array<i64: 2, 128>}, {transform_indices = @transform_13, window_bounds = array<i64: 2, 32>}]} {
    %c0 = arith.constant 0 : index
    %c0_0 = arith.constant 0 : index
    %c0_1 = arith.constant 0 : index
    %0 = vector.load %arg1[%c0, %c0_0, %c0_1] : memref<2x8x32xf32, #tpu.memory_space<vmem>>, vector<2x8x32xf32>
    %cst = arith.constant dense<0.000000e+00> : vector<2x32xf32>
    %1 = vector.multi_reduction <add>, %0, %cst [1] : vector<2x8x32xf32> to vector<2x32xf32>
    %cst_2 = arith.constant 8.000000e+00 : f32
    %2 = vector.broadcast %cst_2 : f32 to vector<2x32xf32>
    %3 = arith.divf %1, %2 : vector<2x32xf32>
    %c0_3 = arith.constant 0 : index
    %c0_4 = arith.constant 0 : index
    %4 = vector.load %arg4[%c0_3, %c0_4] : memref<32x32xf32, #tpu.memory_space<vmem>>, vector<32x32xf32>
    %cst_5 = arith.constant dense<0.000000e+00> : vector<2x32xf32>
    %5 = tpu.matmul %3, %4, %cst_5 {dimension_numbers = #tpu.dot_dimension_numbers<[1], [0], [0], [1], [0, 0, 1, 1], [], []>} : vector<2x32xf32>, vector<32x32xf32>, vector<2x32xf32> -> vector<2x32xf32>
    %c0_6 = arith.constant 0 : index
    %c0_7 = arith.constant 0 : index
    %6 = vector.load %arg5[%c0_6, %c0_7] : memref<1x32xf32, #tpu.memory_space<vmem>>, vector<1x32xf32>
    %7 = vector.broadcast %6 : vector<1x32xf32> to vector<2x32xf32>
    %8 = arith.addf %5, %7 : vector<2x32xf32>
    %c0_8 = arith.constant 0 : index
    %c0_9 = arith.constant 0 : index
    %9 = vector.load %arg8[%c0_8, %c0_9] : memref<1x32xf32, #tpu.memory_space<vmem>>, vector<1x32xf32>
    %10 = vector.broadcast %9 : vector<1x32xf32> to vector<2x32xf32>
    %11 = arith.mulf %8, %10 : vector<2x32xf32>
    %c0_10 = arith.constant 0 : index
    %c0_11 = arith.constant 0 : index
    %12 = vector.load %arg9[%c0_10, %c0_11] : memref<1x32xf32, #tpu.memory_space<vmem>>, vector<1x32xf32>
    %13 = vector.broadcast %12 : vector<1x32xf32> to vector<2x32xf32>
    %14 = arith.addf %11, %13 : vector<2x32xf32>
    %c0_12 = arith.constant 0 : index
    %c0_13 = arith.constant 0 : index
    %15 = vector.load %arg10[%c0_12, %c0_13] : memref<32x32xf32, #tpu.memory_space<vmem>>, vector<32x32xf32>
    %cst_14 = arith.constant dense<0.000000e+00> : vector<2x32xf32>
    %16 = tpu.matmul %14, %15, %cst_14 {dimension_numbers = #tpu.dot_dimension_numbers<[1], [0], [0], [1], [0, 0, 1, 1], [], []>} : vector<2x32xf32>, vector<32x32xf32>, vector<2x32xf32> -> vector<2x32xf32>
    %c0_15 = arith.constant 0 : index
    %c0_16 = arith.constant 0 : index
    %17 = vector.load %arg11[%c0_15, %c0_16] : memref<1x32xf32, #tpu.memory_space<vmem>>, vector<1x32xf32>
    %18 = vector.broadcast %17 : vector<1x32xf32> to vector<2x32xf32>
    %19 = arith.addf %16, %18 : vector<2x32xf32>
    %c0_17 = arith.constant 0 : index
    %c0_18 = arith.constant 0 : index
    %c0_19 = arith.constant 0 : index
    %20 = vector.load %arg2[%c0_17, %c0_18, %c0_19] : memref<2x8x32xf32, #tpu.memory_space<vmem>>, vector<2x8x32xf32>
    %21 = vector.shape_cast %20 : vector<2x8x32xf32> to vector<16x32xf32>
    %c0_20 = arith.constant 0 : index
    %c0_21 = arith.constant 0 : index
    %22 = vector.load %arg6[%c0_20, %c0_21] : memref<32x32xf32, #tpu.memory_space<vmem>>, vector<32x32xf32>
    %cst_22 = arith.constant dense<0.000000e+00> : vector<16x32xf32>
    %23 = tpu.matmul %21, %22, %cst_22 {dimension_numbers = #tpu.dot_dimension_numbers<[1], [0], [0], [1], [0, 0, 1, 1], [], []>} : vector<16x32xf32>, vector<32x32xf32>, vector<16x32xf32> -> vector<16x32xf32>
    %c0_23 = arith.constant 0 : index
    %c0_24 = arith.constant 0 : index
    %24 = vector.load %arg7[%c0_23, %c0_24] : memref<1x32xf32, #tpu.memory_space<vmem>>, vector<1x32xf32>
    %25 = vector.broadcast %24 : vector<1x32xf32> to vector<16x32xf32>
    %26 = arith.addf %23, %25 : vector<16x32xf32>
    %27 = vector.shape_cast %26 : vector<16x32xf32> to vector<2x8x32xf32>
    %28 = vector.shape_cast %19 : vector<2x32xf32> to vector<2x1x32xf32>
    %29 = vector.broadcast %28 : vector<2x1x32xf32> to vector<2x8x32xf32>
    %30 = arith.mulf %27, %29 : vector<2x8x32xf32>
    %31 = vector.shape_cast %30 : vector<2x8x32xf32> to vector<16x32xf32>
    %c0_25 = arith.constant 0 : index
    %c0_26 = arith.constant 0 : index
    %32 = vector.load %arg12[%c0_25, %c0_26] : memref<32x4xf32, #tpu.memory_space<vmem>>, vector<32x4xf32>
    %cst_27 = arith.constant dense<0.000000e+00> : vector<16x4xf32>
    %33 = tpu.matmul %31, %32, %cst_27 {dimension_numbers = #tpu.dot_dimension_numbers<[1], [0], [0], [1], [0, 0, 1, 1], [], []>} : vector<16x32xf32>, vector<32x4xf32>, vector<16x4xf32> -> vector<16x4xf32>
    %34 = vector.shape_cast %33 : vector<16x4xf32> to vector<2x8x4xf32>
    %cst_28 = arith.constant dense<0xFF800000> : vector<2x4xf32>
    %35 = vector.multi_reduction <maximumf>, %34, %cst_28 [1] : vector<2x8x4xf32> to vector<2x4xf32>
    %36 = vector.shape_cast %35 : vector<2x4xf32> to vector<2x1x4xf32>
    %37 = vector.broadcast %36 : vector<2x1x4xf32> to vector<2x8x4xf32>
    %38 = arith.subf %34, %37 : vector<2x8x4xf32>
    %39 = math.exp %38 : vector<2x8x4xf32>
    %cst_29 = arith.constant dense<0.000000e+00> : vector<2x4xf32>
    %40 = vector.multi_reduction <add>, %39, %cst_29 [1] : vector<2x8x4xf32> to vector<2x4xf32>
    %41 = vector.shape_cast %40 : vector<2x4xf32> to vector<2x1x4xf32>
    %42 = tpu.reciprocal %41 : vector<2x1x4xf32> -> vector<2x1x4xf32>
    %43 = vector.broadcast %42 : vector<2x1x4xf32> to vector<2x8x4xf32>
    %44 = arith.mulf %39, %43 : vector<2x8x4xf32>
    %45 = tpu.transpose %44, [0, 2, 1] : vector<2x8x4xf32> -> vector<2x4x8xf32>
    %46 = vector.shape_cast %45 : vector<2x4x8xf32> to vector<2x32xf32>
    %c0_30 = arith.constant 0 : index
    %c0_31 = arith.constant 0 : index
    %47 = vector.load %arg14[%c0_30, %c0_31] : memref<2x32xf32, #tpu.memory_space<vmem>>, vector<2x32xf32>
    tpu.vector_store %arg14[%c0_30, %c0_31], %46 {strides = array<i32>} : memref<2x32xf32, #tpu.memory_space<vmem>>, vector<2x32xf32>,
    %c0_32 = arith.constant 0 : index
    %c0_33 = arith.constant 0 : index
    %c0_34 = arith.constant 0 : index
    %48 = vector.load %arg3[%c0_32, %c0_33, %c0_34] : memref<2x8x32xf32, #tpu.memory_space<vmem>>, vector<2x8x32xf32>
    "tpu.trace_start"() <{level = 10 : i32, message = "bhl,bld->bhd"}> : () -> ()
    %cst_35 = arith.constant dense<0.000000e+00> : vector<2x4x32xf32>
    %49 = tpu.matmul %45, %48, %cst_35 {dimension_numbers = #tpu.dot_dimension_numbers<[2], [1], [1], [2], [0, 0, 0, 1, 1, 2], [0], [0]>} : vector<2x4x8xf32>, vector<2x8x32xf32>, vector<2x4x32xf32> -> vector<2x4x32xf32>
    "tpu.trace_stop"() : () -> ()
    %50 = vector.shape_cast %49 : vector<2x4x32xf32> to vector<2x128xf32>
    %c0_36 = arith.constant 0 : index
    %c0_37 = arith.constant 0 : index
    %51 = vector.load %arg13[%c0_36, %c0_37] : memref<2x128xf32, #tpu.memory_space<vmem>>, vector<2x128xf32>
    tpu.vector_store %arg13[%c0_36, %c0_37], %50 {strides = array<i32>} : memref<2x128xf32, #tpu.memory_space<vmem>>, vector<2x128xf32>,
    return
  }
  func.func @transform_0(%arg0: i32) -> (i32, i32, i32) {
    %c0_i32 = arith.constant 0 : i32
    %c0_i32_0 = arith.constant 0 : i32
    %c0_i32_1 = arith.constant 0 : i32
    return %arg0, %c0_i32, %c0_i32_0 : i32, i32, i32
  }
  func.func @transform_1(%arg0: i32) -> (i32, i32, i32) {
    %c0_i32 = arith.constant 0 : i32
    %c0_i32_0 = arith.constant 0 : i32
    %c0_i32_1 = arith.constant 0 : i32
    return %arg0, %c0_i32, %c0_i32_0 : i32, i32, i32
  }
  func.func @transform_2(%arg0: i32) -> (i32, i32, i32) {
    %c0_i32 = arith.constant 0 : i32
    %c0_i32_0 = arith.constant 0 : i32
    %c0_i32_1 = arith.constant 0 : i32
    return %arg0, %c0_i32, %c0_i32_0 : i32, i32, i32
  }
  func.func @transform_3(%arg0: i32) -> (i32, i32) {
    %c0_i32 = arith.constant 0 : i32
    %c0_i32_0 = arith.constant 0 : i32
    %c0_i32_1 = arith.constant 0 : i32
    return %c0_i32, %c0_i32_0 : i32, i32
  }
  func.func @transform_4(%arg0: i32) -> (i32, i32) {
    %c0_i32 = arith.constant 0 : i32
    %c0_i32_0 = arith.constant 0 : i32
    %c0_i32_1 = arith.constant 0 : i32
    return %c0_i32, %c0_i32_0 : i32, i32
  }
  func.func @transform_5(%arg0: i32) -> (i32, i32) {
    %c0_i32 = arith.constant 0 : i32
    %c0_i32_0 = arith.constant 0 : i32
    %c0_i32_1 = arith.constant 0 : i32
    return %c0_i32, %c0_i32_0 : i32, i32
  }
  func.func @transform_6(%arg0: i32) -> (i32, i32) {
    %c0_i32 = arith.constant 0 : i32
    %c0_i32_0 = arith.constant 0 : i32
    %c0_i32_1 = arith.constant 0 : i32
    return %c0_i32, %c0_i32_0 : i32, i32
  }
  func.func @transform_7(%arg0: i32) -> (i32, i32) {
    %c0_i32 = arith.constant 0 : i32
    %c0_i32_0 = arith.constant 0 : i32
    %c0_i32_1 = arith.constant 0 : i32
    return %c0_i32, %c0_i32_0 : i32, i32
  }
  func.func @transform_8(%arg0: i32) -> (i32, i32) {
    %c0_i32 = arith.constant 0 : i32
    %c0_i32_0 = arith.constant 0 : i32
    %c0_i32_1 = arith.constant 0 : i32
    return %c0_i32, %c0_i32_0 : i32, i32
  }
  func.func @transform_9(%arg0: i32) -> (i32, i32) {
    %c0_i32 = arith.constant 0 : i32
    %c0_i32_0 = arith.constant 0 : i32
    %c0_i32_1 = arith.constant 0 : i32
    return %c0_i32, %c0_i32_0 : i32, i32
  }
  func.func @transform_10(%arg0: i32) -> (i32, i32) {
    %c0_i32 = arith.constant 0 : i32
    %c0_i32_0 = arith.constant 0 : i32
    %c0_i32_1 = arith.constant 0 : i32
    return %c0_i32, %c0_i32_0 : i32, i32
  }
  func.func @transform_11(%arg0: i32) -> (i32, i32) {
    %c0_i32 = arith.constant 0 : i32
    %c0_i32_0 = arith.constant 0 : i32
    %c0_i32_1 = arith.constant 0 : i32
    return %c0_i32, %c0_i32_0 : i32, i32
  }
  func.func @transform_12(%arg0: i32) -> (i32, i32) {
    %c0_i32 = arith.constant 0 : i32
    %c0_i32_0 = arith.constant 0 : i32
    return %arg0, %c0_i32 : i32, i32
  }
  func.func @transform_13(%arg0: i32) -> (i32, i32) {
    %c0_i32 = arith.constant 0 : i32
    %c0_i32_0 = arith.constant 0 : i32
    return %arg0, %c0_i32 : i32, i32
  }
}

</mosaic_0001>

<bundles_post_ra>
// kernel: tpu_custom_call.1
= control target key start
LH: loop header
LB: loop body
LE: loop exit
PB: predicated region body
PF: predicated region fallthrough
CT: control target
= control target key end

     0   :  { %19 = vsyncpa [#allocation3], 0  ;;  %s1562_s0 = inlined_call_operand.hbm [shape: f32[2,8,32], index: 0, kind: input, shape index: {}]   ;;  %s1563_s1 = inlined_call_operand.hbm [shape: f32[2,8,32], index: 1, kind: input, shape index: {}]   ;;  %s1564_s2 = inlined_call_operand.hbm [shape: f32[2,8,32], index: 2, kind: input, shape index: {}]   ;;  %s1565_s3 = inlined_call_operand.vmem [shape: f32[32,32], index: 3, kind: input, shape index: {}]   ;;  %s1566_s4 = inlined_call_operand.vmem [shape: f32[1,32], index: 4, kind: input, shape index: {}]   ;;  %s1567_s5 = inlined_call_operand.hbm [shape: f32[32,32], index: 5, kind: input, shape index: {}]   ;;  %s1568_s6 = inlined_call_operand.vmem [shape: f32[1,32], index: 6, kind: input, shape index: {}]   ;;  %s1569_s7 = inlined_call_operand.hbm [shape: f32[1,32], index: 7, kind: input, shape index: {}]   ;;  %s1570_s8 = inlined_call_operand.hbm [shape: f32[1,32], index: 8, kind: input, shape index: {}]   ;;  %s1571_s9 = inlined_call_operand.vmem [shape: f32[32,32], index: 9, kind: input, shape index: {}]   ;;  %s1572_s10 = inlined_call_operand.vmem [shape: f32[1,32], index: 10, kind: input, shape index: {}]   ;;  %s1573_s11 = inlined_call_operand.vmem [shape: f32[32,4], index: 11, kind: input, shape index: {}]   ;;  %s1574_s12 = inlined_call_operand.hbm [shape: f32[2,128], index: 12, kind: output, shape index: {0}]   ;;  %s1575_s13 = inlined_call_operand.hbm [shape: f32[2,32], index: 13, kind: output, shape index: {1}]  }
   0x1   :  { %20 = vsyncpa [#allocation6], 0 }
   0x2   :  { %21 = vsyncpa [#allocation9], 0 }
   0x3   :  { %22 = vsyncpa [#allocation12], 0 }
   0x4   :  { %23 = vsyncpa [#allocation4], 0 }
   0x5   :  { %24 = vsyncpa [#allocation15], 0  ;;  %s1267_s25 = smov [#allocation5]   ;;  %s1268_s27 = smov [#allocation8]  }
   0x6   :  { %s42_s26 = sshll.u32 %s1267_s25, 4  ;;  %s70_s28 = sshll.u32 %s1268_s27, 4  ;;  %s43_s26 = int_to_ptr.vmem [resolvable:$true] %s42_s26  ;;  %s1358_s28 = int_to_ptr.vmem [resolvable:$true] %s70_s28 }
   0x7   :  { %s1079_s14 = scalar_lea.hbm %s1563_s1, 256 }
   0x8   :  { %p1080_p0 = scmp.ne.s32.totalorder %s1563_s1, %s1079_s14  ;;  %p1083_p1 = scmp.lt.u32.totalorder %s1079_s14, %s1563_s1 }
   0xa   :  { %p1085_p2 = pnand %p1083_p1, %p1080_p0 }
   0xc   :  { %1088 = shalt.err (!%p1085_p2)
}
   0xd   :  { %s1089_s19 = scalar_lea.vmem %s43_s26, 256  ;;  %p1094_p4 = scmp.lt.s32.totalorder %s43_s26, %s43_s26 }
   0xe   :  { %p1090_p3 = scmp.ne.s32.totalorder %s43_s26, %s1089_s19  ;;  %p1095_p5 = scmp.lt.s32.totalorder %s1089_s19, %s1089_s19 }
  0x10   :  { %p1096_p6 = por %p1095_p5, %p1094_p4 }
  0x12   :  { %p1097_p7 = pnand %p1096_p6, %p1090_p3 }
  0x14   :  { %1100 = shalt.err (!%p1097_p7)
}
  0x15   :  { %s1269_s20 = smov 128   ;;  %s1270_s21 = smov 8  }
  0x16   :  { %48 = dma.hbm_to_vmem [thread:$0]  %s1563_s1, 256, %s43_s26, [#allocation6], %s1269_s20, %s1269_s20, %s1270_s21  }
  0x17   :  { %s1101_s27 = scalar_lea.hbm %s1567_s5, 512 }
  0x18   :  { %p1102_p8 = scmp.ne.s32.totalorder %s1567_s5, %s1101_s27  ;;  %p1105_p9 = scmp.lt.u32.totalorder %s1101_s27, %s1567_s5 }
  0x1a   :  { %p1107_p10 = pnand %p1105_p9, %p1102_p8 }
  0x1c   :  { %1110 = shalt.err (!%p1107_p10)
}
  0x1d   :  { %s1111_s16 = scalar_lea.vmem %s1358_s28, 512  ;;  %p1116_p12 = scmp.lt.s32.totalorder %s1358_s28, %s1358_s28 }
  0x1e   :  { %p1112_p11 = scmp.ne.s32.totalorder %s1358_s28, %s1111_s16  ;;  %p1117_p13 = scmp.lt.s32.totalorder %s1111_s16, %s1111_s16 }
  0x20   :  { %p1118_p0 = por %p1117_p13, %p1116_p12 }
  0x22   :  { %p1119_p1 = pnand %p1118_p0, %p1112_p11 }
  0x24   :  { %1122 = shalt.err (!%p1119_p1)
}
  0x25   :  { %76 = dma.hbm_to_vmem [thread:$0]  %s1567_s5, 512, %s1358_s28, [#allocation9], %s1269_s20, %s1269_s20, %s1270_s21  }
  0x26   :  { %s1271_s17 = smov [#allocation2]   ;;  %s1272_s19 = smov [#allocation7]  }
  0x27   :  { %s30_s18 = sshll.u32 %s1271_s17, 4  ;;  %s54_s22 = sshll.u32 %s1272_s19, 4  ;;  %s31_s18 = int_to_ptr.vmem [resolvable:$true] %s30_s18  ;;  %s1395_s22 = int_to_ptr.vmem [resolvable:$true] %s54_s22 }
  0x28   :  { %s1123_s25 = scalar_lea.hbm %s1562_s0, 256 }
  0x29   :  { %p1124_p2 = scmp.ne.s32.totalorder %s1562_s0, %s1123_s25  ;;  %p1127_p3 = scmp.lt.u32.totalorder %s1123_s25, %s1562_s0 }
  0x2b   :  { %p1129_p4 = pnand %p1127_p3, %p1124_p2 }
  0x2d   :  { %1132 = shalt.err (!%p1129_p4)
}
  0x2e   :  { %s1133_s5 = scalar_lea.vmem %s31_s18, 256  ;;  %p1138_p6 = scmp.lt.s32.totalorder %s31_s18, %s31_s18 }
  0x2f   :  { %p1134_p5 = scmp.ne.s32.totalorder %s31_s18, %s1133_s5  ;;  %p1139_p7 = scmp.lt.s32.totalorder %s1133_s5, %s1133_s5 }
  0x31   :  { %p1140_p8 = por %p1139_p7, %p1138_p6 }
  0x33   :  { %p1141_p9 = pnand %p1140_p8, %p1134_p5 }
  0x35   :  { %1144 = shalt.err (!%p1141_p9)
}
  0x36   :  { %36 = dma.hbm_to_vmem [thread:$0]  %s1562_s0, 256, %s31_s18, [#allocation3], %s1269_s20, %s1269_s20, %s1270_s21  }
  0x37   :  { %s1145_s26 = scalar_lea.hbm %s1564_s2, 256 }
  0x38   :  { %p1146_p10 = scmp.ne.s32.totalorder %s1564_s2, %s1145_s26  ;;  %p1149_p11 = scmp.lt.u32.totalorder %s1145_s26, %s1564_s2 }
  0x3a   :  { %p1151_p12 = pnand %p1149_p11, %p1146_p10 }
  0x3c   :  { %1154 = shalt.err (!%p1151_p12)
}
  0x3d   :  { %s1155_s25 = scalar_lea.vmem %s1395_s22, 256  ;;  %p1160_p0 = scmp.lt.s32.totalorder %s1395_s22, %s1395_s22 }
  0x3e   :  { %p1156_p13 = scmp.ne.s32.totalorder %s1395_s22, %s1155_s25  ;;  %p1161_p1 = scmp.lt.s32.totalorder %s1155_s25, %s1155_s25 }
  0x40   :  { %p1162_p2 = por %p1161_p1, %p1160_p0 }
  0x42   :  { %p1163_p3 = pnand %p1162_p2, %p1156_p13 }
  0x44   :  { %1166 = shalt.err (!%p1163_p3)
}
  0x45   :  { %60 = dma.hbm_to_vmem [thread:$0]  %s1564_s2, 256, %s1395_s22, [#allocation6], %s1269_s20, %s1269_s20, %s1270_s21  }
  0x46   :  { %s1273_s27 = smov [#allocation10]   ;;  %s1274_s30 = smov [#allocation11]  }
  0x47   :  { %s85_s29 = sshll.u32 %s1273_s27, 4  ;;  %s95_s14 = sshll.u32 %s1274_s30, 4  ;;  %s86_s29 = int_to_ptr.vmem [resolvable:$true] %s85_s29  ;;  %s96_s14 = int_to_ptr.vmem [resolvable:$true] %s95_s14 }
  0x48   :  { %s1167_s15 = scalar_lea.hbm %s1569_s7, 16 }
  0x49   :  { %p1168_p4 = scmp.ne.s32.totalorder %s1569_s7, %s1167_s15  ;;  %p1171_p5 = scmp.lt.u32.totalorder %s1167_s15, %s1569_s7 }
  0x4b   :  { %p1173_p6 = pnand %p1171_p5, %p1168_p4 }
  0x4d   :  { %1176 = shalt.err (!%p1173_p6)
}
  0x4e   :  { %s1177_s2 = scalar_lea.vmem %s86_s29, 16  ;;  %s1181_s20 = scalar_lea.vmem %s86_s29, 32 }
  0x4f   :  { %p1178_p7 = scmp.ne.s32.totalorder %s86_s29, %s1177_s2  ;;  %p1182_p8 = scmp.lt.s32.totalorder %s86_s29, %s86_s29 }
  0x50   :  { %p1183_p9 = scmp.lt.s32.totalorder %s1181_s20, %s1177_s2 }
  0x52   :  { %p1184_p10 = por %p1183_p9, %p1182_p8 }
  0x54   :  { %p1185_p11 = pnand %p1184_p10, %p1178_p7 }
  0x56   :  { %1188 = shalt.err (!%p1185_p11)
}
  0x57   :  { %88 = dma.hbm_to_vmem [thread:$0]  %s1569_s7, 16, %s86_s29, [#allocation9]  }
  0x58   :  { %s1189_s25 = scalar_lea.hbm %s1570_s8, 16 }
  0x59   :  { %p1190_p12 = scmp.ne.s32.totalorder %s1570_s8, %s1189_s25  ;;  %p1193_p13 = scmp.lt.u32.totalorder %s1189_s25, %s1570_s8 }
  0x5b   :  { %p1195_p0 = pnand %p1193_p13, %p1190_p12 }
  0x5d   :  { %1198 = shalt.err (!%p1195_p0)
}
  0x5e   :  { %s1199_s5 = scalar_lea.vmem %s96_s14, 16  ;;  %s1203_s28 = scalar_lea.vmem %s96_s14, 32 }
  0x5f   :  { %p1200_p1 = scmp.ne.s32.totalorder %s96_s14, %s1199_s5  ;;  %p1204_p2 = scmp.lt.s32.totalorder %s96_s14, %s96_s14 }
  0x60   :  { %p1205_p3 = scmp.lt.s32.totalorder %s1203_s28, %s1199_s5 }
  0x62   :  { %p1206_p4 = por %p1205_p3, %p1204_p2 }
  0x64   :  { %p1207_p5 = pnand %p1206_p4, %p1200_p1 }
  0x66   :  { %1210 = shalt.err (!%p1207_p5)
}
  0x67   :  { %98 = dma.hbm_to_vmem [thread:$0]  %s1570_s8, 16, %s96_s14, [#allocation12]  }
  0x68   :  { %1255 = dma.done.wait [#allocation3], 256  }
  0x69   :  { %1256 = vsyncadd [#allocation3], 4294967040 }
  0x6a   :  { %1257 = dma.done.wait [#allocation6], 512  }
  0x6b   :  { %1258 = vsyncadd [#allocation6], 4294966784 }
  0x6c   :  { %1259 = dma.done.wait [#allocation9], 528  }
  0x6d   :  { %1260 = vsyncadd [#allocation9], 4294966768 }
  0x6e   :  { %1261 = dma.done.wait [#allocation12], 16  }
  0x6f   :  { %1262 = vsyncadd [#allocation12], 4294967280  ;;  %v1275_v0 = vmov 0.0|0.0   ;;  %vm1276_vm0 = vmmov 0   ;;  %v1277_v1 = vmov 0.0   ;;  %vm125_vm1 = vcmask 261120  }
  0x70   :  { %1022 = vmatprep.subr.bf16.mxu0 %v1275_v0  ;;  %976 = vmatprep.mubr.msk.f32.mxu0 %vm1276_vm0, %v1277_v1  ;;  %v143_v2 = vld [vmem:[%s1565_s3] sm:$0xff]  ;;  %v144_v3 = vld [vmem:[%s1565_s3 + $0x8] sm:$0xff]  ;;  %v145_v4 = vld [vmem:[%s1565_s3 + $0x10] sm:$0xff]  ;;  %vm156_vm2 = vcmask 1041409   ;;  %v1278_v57 = vmov 1966171168   ;;  %v428_v59 = vlaneseq }
  0x71   :  { %1028 = vmatprep.subr.bf16.mxu1 %v1275_v0  ;;  %987 = vmatprep.mubr.msk.f32.mxu1 %vm1276_vm0, %v1277_v1  ;;  %v1023_v5 = vpack.c.bf16 %v144_v3, %v143_v2  ;;  %v146_v6 = vld [vmem:[%s1565_s3 + $0x18] sm:$0xff]  ;;  %v123_v7 = vld [vmem:[#allocation2] sm:$0xff]  ;;  %v124_v8 = vld [vmem:[#allocation2 + $0x8] sm:$0xff]  ;;  %v426_v58 = vunpack.c.l.s4 %v1278_v57  ;;  %vm544_vm3 = vcmask 31744   ;;  %vm691_vm4 = vcmask 64512  }
  0x72   :  { %v126_v9 = vsel %vm125_vm1, %v123_v7, 0.0  ;;  %v133_v10 = vsel %vm125_vm1, %v124_v8, 0.0  ;;  %v1026_v11 = vpack.c.bf16 %v146_v6, %v145_v4  ;;  %v246_v27 = vld [vmem:[%s1571_s9] sm:$0xff]  ;;  %v247_v28 = vld [vmem:[%s1571_s9 + $0x8] sm:$0xff]  ;;  %v248_v30 = vld [vmem:[%s1571_s9 + $0x10] sm:$0xff]  ;;  %v1509_v61 = vshrl.u32 %v428_v59, 7 }
  0x73   :  { %1024 = vmatpush3.bf16.msra.mxu0 %v1023_v5  ;;  %v127_v12 = vrot.slane %v126_v9, 4  ;;  %v134_v13 = vrot.slane %v133_v10, 4  ;;  %v1029_v29 = vpack.c.bf16 %v247_v28, %v246_v27  ;;  %v249_v31 = vld [vmem:[%s1571_s9 + $0x18] sm:$0xff]  ;;  %v332_v33 = vld [vmem:[#allocation8] sm:$0xff]  ;;  %v334_v36 = vld [vmem:[#allocation8 + $0x10] sm:$0xff]  ;;  %v427_v60 = vunpack.c.0.s8 %v426_v58 }
  0x74   :  { %1025 = vmatprep.subr.bf16.mxu0 %v1275_v0  ;;  %v1032_v32 = vpack.c.bf16 %v249_v31, %v248_v30  ;;  %v333_v34 = vld [vmem:[#allocation8 + $0x8] sm:$0xff]  ;;  %v335_v37 = vld [vmem:[#allocation8 + $0x18] sm:$0xff]  ;;  %v330_v39 = vld [vmem:[#allocation5] sm:$0xff]  ;;  %v449_v6 = vsub.s32 0, %v1509_v61  ;;  %v1279_v58 = vmov 1983009808  }
  0x75   :  { %v128_v14 = vadd.f32 %v127_v12, %v126_v9  ;;  %v135_v15 = vadd.f32 %v134_v13, %v133_v10  ;;  %1030 = vmatpush3.bf16.msra.mxu1 %v1029_v29  ;;  %v1034_v35 = vpack.c.bf16 %v333_v34, %v332_v33  ;;  %v1038_v38 = vpack.c.bf16 %v335_v37, %v334_v36  ;;  %v331_v40 = vld [vmem:[#allocation5 + $0x8] sm:$0xff]  ;;  %v929_v41 = vld [vmem:[%s1566_s4] ss:$0 sm:$0xff]  ;;  %v931_v43 = vld [vmem:[#allocation10] ss:$0 sm:$0xff] }
  0x76   :  { %1031 = vmatprep.subr.bf16.mxu1 %v1275_v0  ;;  %v932_v46 = vld [vmem:[#allocation11] ss:$0 sm:$0xff]  ;;  %v459_v49 = vld [vmem:[%s1573_s11] sm:$0xff]  ;;  %v460_v50 = vld [vmem:[%s1573_s11 + $0x8] sm:$0xff]  ;;  %v430_v63 = vsub.s32 %v427_v60, %v1509_v61  ;;  %v648_v59 = vunpack.c.l.s4 %v1279_v58  ;;  %vm693_vm5 = vcmask 130048   ;;  %vm695_vm6 = vcmask 195584  }
  0x77   :  { %1027 = vmatpush3.bf16.msra.mxu0 %v1026_v11  ;;  %v129_v16 = vrot.slane %v128_v14, 2  ;;  %v136_v17 = vrot.slane %v135_v15, 2  ;;  %v1042_v51 = vpack.c.bf16 %v460_v50, %v459_v49  ;;  %v461_v53 = vld [vmem:[%s1573_s11 + $0x10] sm:$0xff]  ;;  %v462_v54 = vld [vmem:[%s1573_s11 + $0x18] sm:$0xff]  ;;  %v933_v62 = vld [vmem:[%s1572_s10] ss:$0 sm:$0xff] }
  0x78   :  { %1035 = vmatprep.subr.bf16.mxu0 %v1034_v35  ;;  %v1046_v56 = vpack.c.bf16 %v462_v54, %v461_v53  ;;  %v935_v4 = vld [vmem:[%s1568_s6] ss:$0 sm:$0xff]  ;;  %v649_v60 = vunpack.c.0.s8 %v648_v59  ;;  %s1281_s6 = smov 16   ;;  %s1282_s10 = smov 24   ;;  %vm697_vm7 = vcmask 254976  }
  0x79   :  { %v130_v18 = vadd.f32 %v129_v16, %v128_v14  ;;  %v137_v19 = vadd.f32 %v136_v17, %v135_v15  ;;  %1033 = vmatpush3.bf16.msra.mxu1 %v1032_v32  ;;  %v699_v16 = vld [vmem:[#allocation7] sm:$0xff] }
  0x7a   :  { %1043 = vmatprep.subr.bf16.mxu1 %v1042_v51 }
  0x7b   :  { %v131_v20 = vrot.slane %v130_v18, 1  ;;  %v138_v21 = vrot.slane %v137_v19, 1 }
  0x7d   :  { %v132_v22 = vadd.f32 %v131_v20, %v130_v18  ;;  %v139_v23 = vadd.f32 %v138_v21, %v137_v19 }
  0x7f   :  { %v141_v24 = vmul.f32 0.125, %v132_v22  ;;  %v142_v25 = vmul.f32 0.125, %v139_v23 }
  0x81   :  { %v157_v26 = vsel %vm156_vm2, %v142_v25, %v141_v24 }
  0x82   :  { %977 = vmatmul.mubr.msk.f32.vlgmr.msra.gmra.mrb[0].mxu0 %vm125_vm1, %v157_v26 }
  0x83   :  { %1037 = vmatpush3.bf16.msra.mxu0 %v1034_v35  ;;  %998 = vmatprep.mubr.msk.f32.mxu0 %vm125_vm1, %v330_v39 }
  0x84   :  { %1039 = vmatprep.subr.bf16.mxu0 %v1038_v38 }
  0x87   :  { %1041 = vmatpush3.bf16.msra.mxu0 %v1038_v38 }
  0x88   :  { %1012 = vmatprep.subr.mxu0 %v1277_v1 }
  0x8a   :  { %999 = vmatmul.mubr.msk.f32.vlgmr.msra.gmra.mrb[2].mxu0 %vm125_vm1, %v331_v40 }
  0x8b   :  { %1014 = vmatprep.mubr.msk.f32.mxu0 %vm1276_vm0, %v1277_v1  ;;  %1013 = vmatpush3.msra.mxu0 %v699_v16 }
 0x155   :  { %v226_v42 = vpop.f32.mrb[0].mxu0 }
 0x156   :  { %v227_v44 = vadd.f32 %v929_v41, %v226_v42  ;;  %v978_v45 = vpop.f32.mrb[1].mxu0 }
 0x158   :  { %v237_v47 = vmul.f32 %v931_v43, %v227_v44 }
 0x15a   :  { %v245_v48 = vadd.f32 %v932_v46, %v237_v47 }
 0x15c   :  { %988 = vmatmul.mubr.msk.f32.vlgmr.msra.gmra.mrb[0].mxu1 %vm125_vm1, %v245_v48 }
 0x15d   :  { %v1000_v52 = vpop.f32.mrb[2].mxu0  ;;  %1045 = vmatpush3.bf16.msra.mxu1 %v1042_v51 }
 0x15e   :  { %v415_v55 = vpop.f32.mrb[3].mxu0  ;;  %1047 = vmatprep.subr.bf16.mxu1 %v1046_v56  ;;  %v421_v12 = vadd.f32 %v1000_v52, %v935_v4 }
 0x15f   :  { %v416_v9 = vadd.f32 %v935_v4, %v415_v55 }
 0x161   :  { %1049 = vmatpush3.bf16.msra.mxu1 %v1046_v56  ;;  %v700_v56 = vld [vmem:[#allocation7 + $0x8] sm:$0xff] }
 0x162   :  { %1017 = vmatprep.subr.mxu1 %v1277_v1 }
 0x22f   :  { %v326_v0 = vpop.f32.mrb[0].mxu1 }
 0x230   :  { %v327_v2 = vadd.f32 %v933_v62, %v326_v0  ;;  %v989_v3 = vpop.f32.mrb[1].mxu1  ;;  %v1280_v62 = vmov 1934713408  }
 0x232   :  { %v431_v5 = vrot.slane %v327_v2, %v430_v63  ;;  %v652_v2 = vsub.s32 %v649_v60, %v1509_v61 }
 0x234   :  { %v432_v7 = vcombine.high %v431_v5, %v431_v5  ;;  %v439_v8 = vrot.slane %v431_v5, %v430_v63 }
 0x236   :  { %v446_v10 = vrot.slane %v432_v7, %v430_v63  ;;  %v450_v11 = vrot.slane %v439_v8, %v449_v6  ;;  %v664_v63 = vunpack.c.l.s4 %v1280_v62 }
 0x238   :  { %v454_v13 = vrot.slane %v446_v10, %v449_v6  ;;  %v457_v14 = vmul.f32 %v450_v11, %v416_v9  ;;  %v665_v3 = vunpack.c.0.s8 %v664_v63 }
 0x23a   :  { %v458_v15 = vmul.f32 %v454_v13, %v421_v12  ;;  %1009 = vmatprep.mubr.msk.f32.mxu1 %vm125_vm1, %v457_v14  ;;  %v668_v7 = vsub.s32 %v665_v3, %v1509_v61 }
 0x23c   :  { %1010 = vmatmul.mubr.msk.f32.vlgmr.msra.gmra.mrb[2].mxu1 %vm125_vm1, %v458_v15 }
 0x23d   :  { %1019 = vmatprep.mubr.msk.f32.mxu1 %vm1276_vm0, %v1277_v1  ;;  %1018 = vmatpush3.msra.mxu1 %v700_v56 }
 0x30f   :  { %v1011_v17 = vpop.f32.mrb[2].mxu1 }
 0x310   :  { %v552_v18 = vsel %vm544_vm3, %v1011_v17, -inf  ;;  %v535_v19 = vpop.f32.mrb[3].mxu1 }
 0x311   :  { %v553_v20 = vrot.slane %v552_v18, 4  ;;  %v545_v21 = vsel %vm544_vm3, %v535_v19, -inf }
 0x312   :  { %v546_v22 = vrot.slane %v545_v21, 4 }
 0x313   :  { %v554_v23 = vmax.f32 %v552_v18, %v553_v20 }
 0x314   :  { %v547_v24 = vmax.f32 %v545_v21, %v546_v22 }
 0x315   :  { %v555_v25 = vrot.slane %v554_v23, 2 }
 0x316   :  { %v548_v26 = vrot.slane %v547_v24, 2 }
 0x317   :  { %v556_v27 = vmax.f32 %v554_v23, %v555_v25 }
 0x318   :  { %v549_v28 = vmax.f32 %v547_v24, %v548_v26 }
 0x319   :  { %v557_v29 = vrot.slane %v556_v27, 1 }
 0x31a   :  { %v550_v30 = vrot.slane %v549_v28, 1 }
 0x31b   :  { %v558_v31 = vmax.f32 %v556_v27, %v557_v29 }
 0x31c   :  { %v551_v32 = vmax.f32 %v549_v28, %v550_v30 }
 0x31d   :  { %v560_v33 = vsub.f32 %v1011_v17, %v558_v31 }
 0x31e   :  { %v559_v34 = vsub.f32 %v535_v19, %v551_v32 }
 0x31f   :  { %v563_v35 = vmul.f32 1.442695, %v560_v33 }
 0x320   :  { %v561_v36 = vmul.f32 1.442695, %v559_v34 }
 0x321   :  { %1071 = vpow2.f32 %v563_v35 }
 0x322   :  { %1073 = vpow2.f32 %v561_v36 }
 0x32b   :  { %v1072_v37 = vpop.eup %1071 }
 0x32c   :  { %v1074_v38 = vpop.eup %1073  ;;  %v572_v39 = vsel %vm544_vm3, %v1072_v37, 0.0 }
 0x32d   :  { %v573_v40 = vrot.slane %v572_v39, 4  ;;  %v565_v41 = vsel %vm544_vm3, %v1074_v38, 0.0 }
 0x32e   :  { %v566_v42 = vrot.slane %v565_v41, 4 }
 0x32f   :  { %v574_v43 = vadd.f32 %v573_v40, %v572_v39 }
 0x330   :  { %v567_v44 = vadd.f32 %v566_v42, %v565_v41 }
 0x331   :  { %v575_v45 = vrot.slane %v574_v43, 2 }
 0x332   :  { %v568_v46 = vrot.slane %v567_v44, 2 }
 0x333   :  { %v576_v47 = vadd.f32 %v575_v45, %v574_v43 }
 0x334   :  { %v569_v48 = vadd.f32 %v568_v46, %v567_v44 }
 0x335   :  { %v577_v49 = vrot.slane %v576_v47, 1 }
 0x336   :  { %v570_v50 = vrot.slane %v569_v48, 1 }
 0x337   :  { %v578_v52 = vadd.f32 %v577_v49, %v576_v47 }
 0x338   :  { %v571_v51 = vadd.f32 %v570_v50, %v569_v48 }
 0x33a   :  { %1075 = vrcp.f32 %v571_v51 }
 0x33b   :  { %1077 = vrcp.f32 %v578_v52 }
 0x344   :  { %v1076_v53 = vpop.eup %1075 }
 0x345   :  { %v581_v54 = vmul.f32 %v1076_v53, %v1074_v38  ;;  %v1078_v55 = vpop.eup %1077 }
 0x346   :  { %v582_v57 = vmul.f32 %v1078_v55, %v1072_v37 }
 0x347   :  { %583 = vxpose.xlu0.b32.start.end [1/1] (short) (narrow) %v581_v54, 8 }
 0x34b   :  { %615 = vxpose.xlu0.b32.start.end [1/1] (short) (narrow) %v582_v57, 8 }
 0x3c7   :  { %v599_v0 = vpop.trf.xlu0 }
 0x3c8   :  { %1015 = vmatmul.mubr.msk.f32.vlgmr.msra.gmra.mrb[4].mxu0 %vm691_vm4, %v599_v0  ;;  %v653_v5 = vrot.slane %v599_v0, %v652_v2 }
 0x3cb   :  { %v631_v4 = vpop.trf.xlu0 }
 0x3cc   :  { %v660_v6 = vrot.slane %v631_v4, %v652_v2  ;;  %1020 = vmatmul.mubr.msk.f32.vlgmr.msra.gmra.mrb[4].mxu1 %vm691_vm4, %v631_v4 }
 0x3ce   :  { %v661_v8 = vcombine.low %v653_v5, %v660_v6  ;;  %v662_v9 = vcombine.high %v653_v5, %v660_v6 }
 0x3d0   :  { %v676_v10 = vrot.slane %v662_v9, %v668_v7  ;;  %v669_v11 = vrot.slane %v661_v8, %v668_v7 }
 0x3d2   :  { %684 = vrot.lane.b32.xlu0 %v676_v10, %s1281_s6  ;;  %v677_v12 = vcombine.high %v669_v11, %v1277_v1  ;;  %v678_v13 = vcombine.high %v676_v10, %v1277_v1 }
 0x3d4   :  { %680 = vrot.lane.b32.xlu1 %v677_v12, %s1270_s21  ;;  %s1283_s21 = smov [#allocation14]  }
 0x3d5   :  { %s913_s1 = sshll.u32 %s1283_s21, 4  ;;  %s914_s1 = int_to_ptr.vmem [resolvable:$true] %s913_s1 }
 0x3d6   :  { %s1211_s26 = scalar_lea.vmem %s914_s1, 32  ;;  %p1216_p7 = scmp.lt.s32.totalorder %s914_s1, %s914_s1 }
 0x3d7   :  { %p1212_p6 = scmp.ne.s32.totalorder %s914_s1, %s1211_s26  ;;  %p1217_p8 = scmp.lt.s32.totalorder %s1211_s26, %s1211_s26 }
 0x3d8   :  { %688 = vrot.lane.b32.xlu1 %v678_v13, %s1282_s10 }
 0x3d9   :  { %p1218_p9 = por %p1217_p8, %p1216_p7 }
 0x3db   :  { %p1219_p10 = pnand %p1218_p9, %p1212_p6 }
 0x444   :  { %v685_v61 = vpop.permute.xlu0 %684 }
 0x446   :  { %v681_v14 = vpop.permute.xlu1 %680 }
 0x447   :  { %v692_v15 = vsel %vm691_vm4, %v669_v11, %v681_v14 }
 0x448   :  { %v694_v16 = vsel %vm693_vm5, %v692_v15, %v685_v61 }
 0x44a   :  { %v689_v17 = vpop.permute.xlu1 %688 }
 0x44b   :  { %v696_v18 = vsel %vm695_vm6, %v694_v16, %v689_v17 }
 0x44c   :  { %698 = vst.msk [vmem:[#allocation14] sm:$0x3] %vm697_vm7, %v696_v18 }
 0x49b   :  { %v770_v19 = vpop.f32.mrb[4].mxu0 }
 0x49c   :  { %v1016_v20 = vpop.f32.mrb[5].mxu0  ;;  %v853_v22 = vrot.slane %v770_v19, %v652_v2 }
 0x49f   :  { %v843_v21 = vpop.f32.mrb[4].mxu1 }
 0x4a0   :  { %v860_v23 = vrot.slane %v843_v21, %v652_v2  ;;  %v1021_v24 = vpop.f32.mrb[5].mxu1 }
 0x4a2   :  { %v861_v25 = vcombine.low %v853_v22, %v860_v23  ;;  %v862_v26 = vcombine.high %v853_v22, %v860_v23 }
 0x4a3   :  { %1222 = shalt.err (!%p1219_p10)
}
 0x4a4   :  { %s1223_s3 = scalar_lea.hbm %s1575_s13, 32 }
 0x4a5   :  { %p1224_p11 = scmp.ne.s32.totalorder %s1575_s13, %s1223_s3  ;;  %p1227_p12 = scmp.lt.u32.totalorder %s1223_s3, %s1575_s13 }
 0x4a7   :  { %p1229_p13 = pnand %p1227_p12, %p1224_p11 }
 0x4a9   :  { %1232 = shalt.err (!%p1229_p13)
}
 0x4aa   :  { %916 = dma.vmem_to_hbm [thread:$0]  %s914_s1, 32, %s1575_s13, [#allocation15]   ;;  %v869_v27 = vrot.slane %v861_v25, %v668_v7  ;;  %v876_v28 = vrot.slane %v862_v26, %v668_v7  ;;  %vm892_vm8 = vcmask 523264   ;;  %vm894_vm9 = vcmask 785408  }
 0x4ab   :  { %s1284_s0 = smov 64   ;;  %s1285_s9 = smov 32  }
 0x4ac   :  { %884 = vrot.lane.b32.xlu1 %v876_v28, %s1284_s0  ;;  %v877_v29 = vcombine.high %v869_v27, %v1277_v1  ;;  %v878_v30 = vcombine.high %v876_v28, %v1277_v1  ;;  %s1286_s18 = smov 96   ;;  %s1287_s27 = smov [#allocation13]  }
 0x4ad   :  { %s903_s30 = sshll.u32 %s1287_s27, 4  ;;  %s904_s30 = int_to_ptr.vmem [resolvable:$true] %s903_s30 }
 0x4ae   :  { %s1233_s13 = scalar_lea.vmem %s904_s30, 32  ;;  %p1238_p1 = scmp.lt.s32.totalorder %s904_s30, %s904_s30 }
 0x4af   :  { %p1234_p0 = scmp.ne.s32.totalorder %s904_s30, %s1233_s13  ;;  %p1239_p2 = scmp.lt.s32.totalorder %s1233_s13, %s1233_s13 }
 0x4b0   :  { %880 = vrot.lane.b32.xlu1 %v877_v29, %s1285_s9 }
 0x4b1   :  { %p1240_p3 = por %p1239_p2, %p1238_p1 }
 0x4b3   :  { %p1241_p4 = pnand %p1240_p3, %p1234_p0 }
 0x4b4   :  { %888 = vrot.lane.b32.xlu1 %v878_v30, %s1286_s18 }
 0x51e   :  { %v885_v31 = vpop.permute.xlu1 %884 }
 0x522   :  { %v881_v32 = vpop.permute.xlu1 %880 }
 0x523   :  { %v891_v33 = vsel %vm125_vm1, %v869_v27, %v881_v32 }
 0x524   :  { %v893_v34 = vsel %vm892_vm8, %v891_v33, %v885_v31 }
 0x526   :  { %v889_v35 = vpop.permute.xlu1 %888 }
 0x527   :  { %v895_v36 = vsel %vm894_vm9, %v893_v34, %v889_v35 }
 0x528   :  { %896 = vst [vmem:[#allocation13] sm:$0x3] %v895_v36 }
 0x529   :  { %1244 = shalt.err (!%p1241_p4)
}
 0x52a   :  { %s1245_s4 = scalar_lea.hbm %s1574_s12, 32 }
 0x52b   :  { %p1246_p5 = scmp.ne.s32.totalorder %s1574_s12, %s1245_s4  ;;  %p1249_p6 = scmp.lt.u32.totalorder %s1245_s4, %s1574_s12 }
 0x52d   :  { %p1251_p7 = pnand %p1249_p6, %p1246_p5 }
 0x52f   :  { %1254 = shalt.err (!%p1251_p7)
}
 0x530   :  { %906 = dma.vmem_to_hbm [thread:$0]  %s904_s30, 32, %s1574_s12, [#allocation4]  }
 0x531   :  { %1263 = dma.done.wait [#allocation4], 32  }
 0x532   :  { %1264 = vsyncadd [#allocation4], 4294967264 }
 0x533   :  { %1265 = dma.done.wait [#allocation15], 32  }
 0x534   :  { %1266 = vsyncadd [#allocation15], 4294967264 }
 0x535   :  { %923 = vsyncpa [#allocation3], 1 }
 0x536   :  { %924 = vsyncpa [#allocation6], 1 }
 0x537   :  { %925 = vsyncpa [#allocation9], 1 }
 0x538   :  { %926 = vsyncpa [#allocation12], 1 }
 0x539   :  { %927 = vsyncpa [#allocation4], 1 }
 0x53a   :  { %928 = vsyncpa [#allocation15], 1 }

</bundles_post_ra>
